<compile_context>
chip_gen: v5e
topology: v5e:2x2
jax: 0.10.0
libtpu: 0.0.40
codegen_flags: <defaults>
</compile_context>

<pallas_src>
import functools

import jax
import jax.numpy as jnp
import numpy as np
from jax.experimental import pallas as pl
from jax.experimental.pallas import tpu as pltpu


def _round_up(x, m):
    return ((x + m - 1) // m) * m


def actor_net_kernel(x_ref, w1_ref, b1_ref, w2_ref, b2_ref, o_ref):
    # fc1 + ReLU: K = state_dim is tiny, so do unrolled VPU broadcast-FMAs rather than
    # paying full MXU push/pop latency for a <2%-utilized systolic pass.
    x = x_ref[...]                    # (TILE_B, S)
    w1 = w1_ref[...]                  # (S, H)
    h = b1_ref[...]                   # (1, H) -> broadcasts on the first add
    for k in range(x.shape[1]):       # S is static; unrolled at trace time
        h = h + x[:, k:k + 1] * w1[k:k + 1, :]
    h = jnp.maximum(h, 0.0)           # (TILE_B, H)

    # fc2 on the MXU (K = hidden_dim), output columns padded to a lane-dense multiple of 128.
    logits = jnp.dot(h, w2_ref[...], preferred_element_type=jnp.float32)
    logits = logits + b2_ref[...]     # padded columns carry a -1e30 bias

    # Numerically-stable softmax over the action dim; padded columns underflow to exactly 0.
    m = jnp.max(logits, axis=1, keepdims=True)
    e = jnp.exp(logits - m)
    denom = jnp.sum(e, axis=1, keepdims=True)
    o_ref[...] = (e * pl.reciprocal(denom, approx=True)).astype(o_ref.dtype)


@functools.partial(jax.jit, static_argnames=("tile_b",))
def actor_net_forward(x, w1, b1, w2, b2, *, tile_b=256):
    """x: (B, S) f32; w1: (S, H); b1: (1, H); w2: (H, A); b2: (1, A) -> (B, A) probs."""
    B, S = x.shape
    H = w1.shape[1]
    A = w2.shape[1]

    a_pad = _round_up(A, 128)                 # lane-dense output slab
    tb = min(tile_b, _round_up(B, 8))         # batch tile, multiple of 8
    b_pad = _round_up(B, tb)
    grid_b = b_pad // tb

    xp = x.astype(jnp.float32)
    if b_pad != B:
        xp = jnp.pad(xp, ((0, b_pad - B), (0, 0)))
    w2p = jnp.zeros((H, a_pad), jnp.float32).at[:, :A].set(w2.astype(jnp.float32))
    # -1e30 bias on padded columns => exp(pad - max) == 0, softmax untouched on real cols.
    b2p = jnp.full((1, a_pad), -1e30, jnp.float32).at[:, :A].set(b2.astype(jnp.float32))

    cost = pl.CostEstimate(
        flops=2 * b_pad * (S * H + H * a_pad),
        transcendentals=b_pad * a_pad,
        bytes_accessed=4 * (xp.size + w1.size + b1.size + w2p.size + b2p.size
                            + b_pad * a_pad),
    )

    out = pl.pallas_call(
        actor_net_kernel,
        out_shape=jax.ShapeDtypeStruct((b_pad, a_pad), jnp.float32),
        grid=(grid_b,),
        in_specs=[
            pl.BlockSpec((tb, S), lambda i: (i, 0)),       # x: tiled over batch
            pl.BlockSpec((S, H), lambda i: (0, 0)),        # weights stay VMEM-resident
            pl.BlockSpec((1, H), lambda i: (0, 0)),
            pl.BlockSpec((H, a_pad), lambda i: (0, 0)),
            pl.BlockSpec((1, a_pad), lambda i: (0, 0)),
        ],
        out_specs=pl.BlockSpec((tb, a_pad), lambda i: (i, 0)),
        compiler_params=pltpu.CompilerParams(
            dimension_semantics=("parallel",),             # shards batch tiles on v7x's 2 TCs
        ),
        cost_estimate=cost,
    )(xp, w1.astype(jnp.float32), b1.astype(jnp.float32), w2p, b2p)

    return out[:B, :A]


def init_params(key, state_dim, hidden_dim, action_dim):
    # Deterministic PyTorch-style uniform(-1/sqrt(fan_in), 1/sqrt(fan_in)) init.
    k1, k2, k3, k4 = jax.random.split(key, 4)
    lim1 = 1.0 / np.sqrt(state_dim)
    lim2 = 1.0 / np.sqrt(hidden_dim)
    w1 = jax.random.uniform(k1, (state_dim, hidden_dim), jnp.float32, -lim1, lim1)
    b1 = jax.random.uniform(k2, (1, hidden_dim), jnp.float32, -lim1, lim1)
    w2 = jax.random.uniform(k3, (hidden_dim, action_dim), jnp.float32, -lim2, lim2)
    b2 = jax.random.uniform(k4, (1, action_dim), jnp.float32, -lim2, lim2)
    return w1, b1, w2, b2


def reference_forward(x, w1, b1, w2, b2):
    h = jnp.maximum(x @ w1 + b1, 0.0)
    return jax.nn.softmax(h @ w2 + b2, axis=1)


if __name__ == "__main__":
    # Small shapes consistent with the A3C actor: batch=8, state_dim=4,
    # hidden_dim=32, action_dim=2.
    batch, state_dim, hidden_dim, action_dim = 8, 4, 32, 2

    key = jax.random.PRNGKey(0)
    k_x, k_p, k_xl = jax.random.split(key, 3)
    x = jax.random.normal(k_x, (batch, state_dim), dtype=jnp.float32)
    w1, b1, w2, b2 = init_params(k_p, state_dim, hidden_dim, action_dim)

    probs = actor_net_forward(x, w1, b1, w2, b2)
    jax.block_until_ready(probs)

    ref = reference_forward(x, w1, b1, w2, b2)
    # approx reciprocal (EUP vrcp) => relax tolerances from 1e-5 to ~2e-3
    np.testing.assert_allclose(np.asarray(probs), np.asarray(ref), rtol=2e-3, atol=2e-3)
    np.testing.assert_allclose(np.asarray(probs).sum(axis=1), np.ones(batch),
                               rtol=2e-3, atol=2e-3)

    # Exercise the batched/tiled grid path (multiple batch tiles, resident weights).
    big_b = 512
    x_big = jax.random.normal(k_xl, (big_b, state_dim), dtype=jnp.float32)
    probs_big = actor_net_forward(x_big, w1, b1, w2, b2)
    jax.block_until_ready(probs_big)
    ref_big = reference_forward(x_big, w1, b1, w2, b2)
    np.testing.assert_allclose(np.asarray(probs_big), np.asarray(ref_big),
                               rtol=2e-3, atol=2e-3)

    print("KERNEL_OK")
</pallas_src>

<mosaic_0001>
module attributes {stable_mosaic.version = 11 : i64} {
  func.func @actor_net_kernel(%arg0: i32, %arg1: memref<8x4xf32, #tpu.memory_space<vmem>>, %arg2: memref<4x32xf32, #tpu.memory_space<vmem>>, %arg3: memref<1x32xf32, #tpu.memory_space<vmem>>, %arg4: memref<32x128xf32, #tpu.memory_space<vmem>>, %arg5: memref<1x128xf32, #tpu.memory_space<vmem>>, %arg6: memref<8x128xf32, #tpu.memory_space<vmem>>) attributes {dimension_semantics = [#tpu.dimension_semantics<parallel>], iteration_bounds = array<i64: 1>, scalar_prefetch = 0 : i64, scratch_operands = 0 : i64, tpu.core_type = #tpu.core_type<tc>, window_params = [{transform_indices = @transform_0, window_bounds = array<i64: 8, 4>}, {pipeline_mode = #tpu.pipeline_mode<synchronous>, transform_indices = @transform_1, window_bounds = array<i64: 4, 32>}, {pipeline_mode = #tpu.pipeline_mode<synchronous>, transform_indices = @transform_2, window_bounds = array<i64: 1, 32>}, {pipeline_mode = #tpu.pipeline_mode<synchronous>, transform_indices = @transform_3, window_bounds = array<i64: 32, 128>}, {pipeline_mode = #tpu.pipeline_mode<synchronous>, transform_indices = @transform_4, window_bounds = array<i64: 1, 128>}, {transform_indices = @transform_5, window_bounds = array<i64: 8, 128>}]} {
    %c0 = arith.constant 0 : index
    %c0_0 = arith.constant 0 : index
    %0 = vector.load %arg1[%c0, %c0_0] : memref<8x4xf32, #tpu.memory_space<vmem>>, vector<8x4xf32>
    %c0_1 = arith.constant 0 : index
    %c0_2 = arith.constant 0 : index
    %1 = vector.load %arg2[%c0_1, %c0_2] : memref<4x32xf32, #tpu.memory_space<vmem>>, vector<4x32xf32>
    %c0_3 = arith.constant 0 : index
    %c0_4 = arith.constant 0 : index
    %2 = vector.load %arg3[%c0_3, %c0_4] : memref<1x32xf32, #tpu.memory_space<vmem>>, vector<1x32xf32>
    %3 = vector.extract_strided_slice %0 {offsets = [0, 0], sizes = [8, 1], strides = [1, 1]} : vector<8x4xf32> to vector<8x1xf32>
    %4 = vector.extract_strided_slice %1 {offsets = [0, 0], sizes = [1, 32], strides = [1, 1]} : vector<4x32xf32> to vector<1x32xf32>
    %5 = vector.broadcast %3 : vector<8x1xf32> to vector<8x32xf32>
    %6 = vector.broadcast %4 : vector<1x32xf32> to vector<8x32xf32>
    %7 = arith.mulf %5, %6 : vector<8x32xf32>
    %8 = vector.broadcast %2 : vector<1x32xf32> to vector<8x32xf32>
    %9 = arith.addf %8, %7 : vector<8x32xf32>
    %10 = vector.extract_strided_slice %0 {offsets = [0, 1], sizes = [8, 1], strides = [1, 1]} : vector<8x4xf32> to vector<8x1xf32>
    %11 = vector.extract_strided_slice %1 {offsets = [1, 0], sizes = [1, 32], strides = [1, 1]} : vector<4x32xf32> to vector<1x32xf32>
    %12 = vector.broadcast %10 : vector<8x1xf32> to vector<8x32xf32>
    %13 = vector.broadcast %11 : vector<1x32xf32> to vector<8x32xf32>
    %14 = arith.mulf %12, %13 : vector<8x32xf32>
    %15 = arith.addf %9, %14 : vector<8x32xf32>
    %16 = vector.extract_strided_slice %0 {offsets = [0, 2], sizes = [8, 1], strides = [1, 1]} : vector<8x4xf32> to vector<8x1xf32>
    %17 = vector.extract_strided_slice %1 {offsets = [2, 0], sizes = [1, 32], strides = [1, 1]} : vector<4x32xf32> to vector<1x32xf32>
    %18 = vector.broadcast %16 : vector<8x1xf32> to vector<8x32xf32>
    %19 = vector.broadcast %17 : vector<1x32xf32> to vector<8x32xf32>
    %20 = arith.mulf %18, %19 : vector<8x32xf32>
    %21 = arith.addf %15, %20 : vector<8x32xf32>
    %22 = vector.extract_strided_slice %0 {offsets = [0, 3], sizes = [8, 1], strides = [1, 1]} : vector<8x4xf32> to vector<8x1xf32>
    %23 = vector.extract_strided_slice %1 {offsets = [3, 0], sizes = [1, 32], strides = [1, 1]} : vector<4x32xf32> to vector<1x32xf32>
    %24 = vector.broadcast %22 : vector<8x1xf32> to vector<8x32xf32>
    %25 = vector.broadcast %23 : vector<1x32xf32> to vector<8x32xf32>
    %26 = arith.mulf %24, %25 : vector<8x32xf32>
    %27 = arith.addf %21, %26 : vector<8x32xf32>
    %cst = arith.constant 0.000000e+00 : f32
    %28 = vector.broadcast %cst : f32 to vector<8x32xf32>
    %29 = arith.maximumf %27, %28 : vector<8x32xf32>
    %c0_5 = arith.constant 0 : index
    %c0_6 = arith.constant 0 : index
    %30 = vector.load %arg4[%c0_5, %c0_6] : memref<32x128xf32, #tpu.memory_space<vmem>>, vector<32x128xf32>
    %cst_7 = arith.constant dense<0.000000e+00> : vector<8x128xf32>
    %31 = tpu.matmul %29, %30, %cst_7 {dimension_numbers = #tpu.dot_dimension_numbers<[1], [0], [0], [1], [0, 0, 1, 1], [], []>} : vector<8x32xf32>, vector<32x128xf32>, vector<8x128xf32> -> vector<8x128xf32>
    %c0_8 = arith.constant 0 : index
    %c0_9 = arith.constant 0 : index
    %32 = vector.load %arg5[%c0_8, %c0_9] : memref<1x128xf32, #tpu.memory_space<vmem>>, vector<1x128xf32>
    %33 = vector.broadcast %32 : vector<1x128xf32> to vector<8x128xf32>
    %34 = arith.addf %31, %33 : vector<8x128xf32>
    %cst_10 = arith.constant dense<0xFF800000> : vector<8xf32>
    %35 = vector.multi_reduction <maximumf>, %34, %cst_10 [1] : vector<8x128xf32> to vector<8xf32>
    %36 = vector.shape_cast %35 : vector<8xf32> to vector<8x1xf32>
    %37 = vector.broadcast %36 : vector<8x1xf32> to vector<8x128xf32>
    %38 = arith.subf %34, %37 : vector<8x128xf32>
    %39 = math.exp %38 : vector<8x128xf32>
    %cst_11 = arith.constant dense<0.000000e+00> : vector<8xf32>
    %40 = vector.multi_reduction <add>, %39, %cst_11 [1] : vector<8x128xf32> to vector<8xf32>
    %41 = vector.shape_cast %40 : vector<8xf32> to vector<8x1xf32>
    %42 = tpu.reciprocal %41 {approx = true} : vector<8x1xf32> -> vector<8x1xf32>
    %43 = vector.broadcast %42 : vector<8x1xf32> to vector<8x128xf32>
    %44 = arith.mulf %39, %43 : vector<8x128xf32>
    %c0_12 = arith.constant 0 : index
    %c0_13 = arith.constant 0 : index
    %45 = vector.load %arg6[%c0_12, %c0_13] : memref<8x128xf32, #tpu.memory_space<vmem>>, vector<8x128xf32>
    tpu.vector_store %arg6[%c0_12, %c0_13], %44 {strides = array<i32>} : memref<8x128xf32, #tpu.memory_space<vmem>>, vector<8x128xf32>,
    return
  }
  func.func @transform_0(%arg0: i32) -> (i32, i32) {
    %c0_i32 = arith.constant 0 : i32
    %c0_i32_0 = arith.constant 0 : i32
    return %arg0, %c0_i32 : i32, i32
  }
  func.func @transform_1(%arg0: i32) -> (i32, i32) {
    %c0_i32 = arith.constant 0 : i32
    %c0_i32_0 = arith.constant 0 : i32
    %c0_i32_1 = arith.constant 0 : i32
    return %c0_i32, %c0_i32_0 : i32, i32
  }
  func.func @transform_2(%arg0: i32) -> (i32, i32) {
    %c0_i32 = arith.constant 0 : i32
    %c0_i32_0 = arith.constant 0 : i32
    %c0_i32_1 = arith.constant 0 : i32
    return %c0_i32, %c0_i32_0 : i32, i32
  }
  func.func @transform_3(%arg0: i32) -> (i32, i32) {
    %c0_i32 = arith.constant 0 : i32
    %c0_i32_0 = arith.constant 0 : i32
    %c0_i32_1 = arith.constant 0 : i32
    return %c0_i32, %c0_i32_0 : i32, i32
  }
  func.func @transform_4(%arg0: i32) -> (i32, i32) {
    %c0_i32 = arith.constant 0 : i32
    %c0_i32_0 = arith.constant 0 : i32
    %c0_i32_1 = arith.constant 0 : i32
    return %c0_i32, %c0_i32_0 : i32, i32
  }
  func.func @transform_5(%arg0: i32) -> (i32, i32) {
    %c0_i32 = arith.constant 0 : i32
    %c0_i32_0 = arith.constant 0 : i32
    return %arg0, %c0_i32 : i32, i32
  }
}

</mosaic_0001>

<bundles_post_ra>
// kernel: actor_net_forward.1
= control target key start
LH: loop header
LB: loop body
LE: loop exit
PB: predicated region body
PF: predicated region fallthrough
CT: control target
= control target key end

     0   :  { %v118_v0 = vmov 0   ;;  %v119_v2 = vmov 2   ;;  %v120_v3 = vmov 1   ;;  %v121_v4 = vmov 3   ;;  %s179_s0 = inlined_call_operand.vmem [shape: f32[8,4], index: 0, kind: input, shape index: {}]   ;;  %s180_s2 = inlined_call_operand.vmem [shape: f32[1,32], index: 2, kind: input, shape index: {}]   ;;  %s181_s4 = inlined_call_operand.vmem [shape: f32[1,128], index: 4, kind: input, shape index: {}]   ;;  %s182_s3 = inlined_call_operand.vmem [shape: f32[32,128], index: 3, kind: input, shape index: {}]   ;;  %s183_s1 = inlined_call_operand.vmem [shape: f32[4,32], index: 1, kind: input, shape index: {}]   ;;  %s184_s5 = inlined_call_operand.vmem [shape: f32[8,128], index: 5, kind: output, shape index: {}]  }
   0x1   :  { %107 = vset.pattern.permute.xlu0 %v118_v0  ;;  %v20_v1 = vld [vmem:[%s179_s0] sm:$0xff]  ;;  %109 = vset.pattern.permute.xlu1 %v119_v2  ;;  %v59_v5 = vld [vmem:[%s182_s3 + $0x18] sm:$0xff]  ;;  %v58_v6 = vld [vmem:[%s182_s3 + $0x10] sm:$0xff]  ;;  %vm64_vm0 = vcmask 261120  }
   0x2   :  { %25 = vperm.xlu0 %107, %v20_v1   ;;  %42 = vperm.xlu1 %109, %v20_v1   ;;  %v57_v7 = vld [vmem:[%s182_s3 + $0x8] sm:$0xff]  ;;  %v56_v8 = vld [vmem:[%s182_s3] sm:$0xff] }
   0x3   :  { %80 = vmatpush.msra.mxu0 %v59_v5  ;;  %v21_v9 = vld [vmem:[%s183_s1] sm:$0xf] }
   0x4   :  { %v28_v12 = vperm.slane %v21_v9, 0  ;;  %v112_v13 = vld [vmem:[%s180_s2] ss:$0 sm:$0xff]  ;;  %v38_v15 = vperm.slane %v21_v9, 1  ;;  %v45_v16 = vperm.slane %v21_v9, 2  ;;  %v52_v17 = vperm.slane %v21_v9, 3 }
   0x5   :  { %81 = vmatpush.msra.mxu0 %v58_v6  ;;  %v113_v28 = vld [vmem:[%s181_s4] ss:$0 sm:$0xff] }
   0x7   :  { %82 = vmatpush.msra.mxu0 %v57_v7 }
   0x9   :  { %83 = vmatpush.msra.mxu0 %v56_v8 }
   0xa   :  { %108 = vset.pattern.permute.xlu0 %v120_v3  ;;  %110 = vset.pattern.permute.xlu1 %v121_v4 }
   0xb   :  { %35 = vperm.xlu0 %108, %v20_v1   ;;  %49 = vperm.xlu1 %110, %v20_v1  }
  0x13   :  { %111 = vset.pattern.permute.xlu0 %v121_v4 }
  0x74   :  { %v26_v10 = vpop.permute.xlu0 %25  ;;  %v43_v11 = vpop.permute.xlu1 %42 }
  0x75   :  { %v29_v14 = vmul.f32 %v28_v12, %v26_v10  ;;  %v46_v22 = vmul.f32 %v45_v16, %v43_v11 }
  0x77   :  { %v33_v20 = vadd.f32 %v112_v13, %v29_v14 }
  0x7d   :  { %v36_v18 = vpop.permute.xlu0 %35  ;;  %v50_v19 = vpop.permute.xlu1 %49 }
  0x7e   :  { %v39_v21 = vmul.f32 %v38_v15, %v36_v18  ;;  %v53_v24 = vmul.f32 %v52_v17, %v50_v19 }
  0x80   :  { %v40_v23 = vadd.f32 %v39_v21, %v33_v20 }
  0x82   :  { %v47_v25 = vadd.f32 %v46_v22, %v40_v23 }
  0x84   :  { %v54_v26 = vadd.f32 %v53_v24, %v47_v25 }
  0x86   :  { %v55_v27 = vmax.f32 %v54_v26, 0.0 }
  0x88   :  { %102 = vmatmul.msk.f32.vlgmr.msra.gmra.mxu0 %vm64_vm0, %v55_v27 }
 0x105   :  { %v85_v29 = vpop.f32.mrf.mxu0 }
 0x106   :  { %v86_v30 = vadd.f32 %v113_v28, %v85_v29 }
 0x108   :  { %88 = vmax.xlane.f32.xlu2 %v86_v30 }
 0x17b   :  { %v89_v31 = vpop.xlane.xlu2 %88 }
 0x17c   :  { %v90_v32 = vsub.f32 %v86_v30, %v89_v31 }
 0x17e   :  { %v91_v33 = vmul.f32 1.442695, %v90_v32 }
 0x180   :  { %114 = vpow2.f32 %v91_v33 }
 0x186   :  { %v115_v34 = vpop.eup %114 }
 0x187   :  { %93 = vadd.xlane.f32.xlu2 %v115_v34 }
 0x1fa   :  { %v94_v35 = vpop.xlane.xlu2 %93 }
 0x1fb   :  { %116 = vrcp.f32 %v94_v35 }
 0x201   :  { %v117_v36 = vpop.eup %116 }
 0x202   :  { %v96_v37 = vmul.f32 %v117_v36, %v115_v34 }
 0x204   :  { %97 = vst [vmem:[%s184_s5] sm:$0xff] %v96_v37 }

</bundles_post_ra>
